<compile_context>
chip_gen: v7x
topology: tpu7x:2x2x1
jax: 0.10.0
libtpu: 0.0.40
codegen_flags: <defaults>
</compile_context>

<pallas_src>
import jax
import jax.numpy as jnp
from jax.experimental import pallas as pl
from jax.experimental.pallas import tpu as pltpu


def _round_up(x: int, m: int) -> int:
    return ((x + m - 1) // m) * m


def _head_kernel(h0_ref, wp_ref, bp_ref, w1_ref, b1_ref, w2_ref, b2_ref, out_ref):
    """Fused pooler + classification head for one batch tile.

    h0_ref : [TB, H]  bf16  first-token hidden states (tile of the batch)
    wp_ref : [H, H]   bf16  pooler dense weight, stored [in, out] (resident)
    bp_ref : [1, H]   f32   pooler dense bias (resident)
    w1_ref : [H, H]   bf16  cls_layer[0] weight, stored [in, out] (resident)
    b1_ref : [1, H]   f32   cls_layer[0] bias (resident)
    w2_ref : [1, H]   f32   cls_layer[2] weight row (resident)
    b2_ref : [1, 1]   f32   cls_layer[2] bias (SMEM scalar)
    out_ref: [TB, 1]  f32   logits for this batch tile
    """
    # ALBERT pooler: tanh(h0 @ Wp + bp). bf16 MXU inputs, f32 accumulation,
    # f32 tanh on the EUP.
    pooled = jnp.tanh(
        jnp.dot(h0_ref[...], wp_ref[...], preferred_element_type=jnp.float32)
        + bp_ref[...]
    )

    # Dropout(p=0.1) -> identity (inference mode).

    # cls_layer[0]: Linear(H, H) + Tanh.
    hidden = jnp.tanh(
        jnp.dot(pooled.astype(jnp.bfloat16), w1_ref[...],
                preferred_element_type=jnp.float32)
        + b1_ref[...]
    )

    # cls_layer[2]: Linear(H, 1) as a VPU multiply + lane reduction (XLU),
    # instead of an N=1 MXU matmul that would use 1/128 of the MXU lanes.
    logits = jnp.sum(hidden * w2_ref[...], axis=-1, keepdims=True) + b2_ref[0, 0]

    out_ref[...] = logits.astype(out_ref.dtype)


def endpoint_classifier_head(h0, wp, bp, w1, b1, w2_row, b2, *, target_batch_tile=256):
    """Calls the fused Pallas head kernel with a batch grid.

    Weights are kept VMEM-resident (constant index_map); h0 / logits tiles are
    pipelined over the batch grid.
    """
    B, H = h0.shape
    h0 = h0.astype(jnp.bfloat16)

    # Batch tile: multiple of 8 sublanes; cap at target_batch_tile so large
    # batches pipeline and shard across TensorCores (and fit v7x's 64 MiB VMEM).
    TB = min(int(target_batch_tile), _round_up(B, 8))
    Bp = _round_up(B, TB)
    if Bp != B:
        h0 = jnp.pad(h0, ((0, Bp - B), (0, 0)))

    grid = (Bp // TB,)

    out = pl.pallas_call(
        _head_kernel,
        out_shape=jax.ShapeDtypeStruct((Bp, 1), jnp.float32),
        grid_spec=pltpu.PrefetchScalarGridSpec(
            num_scalar_prefetch=0,
            grid=grid,
            in_specs=[
                pl.BlockSpec((TB, H), lambda i: (i, 0)),   # h0 tile (pipelined)
                pl.BlockSpec((H, H), lambda i: (0, 0)),    # Wp  (resident)
                pl.BlockSpec((1, H), lambda i: (0, 0)),    # bp  (resident)
                pl.BlockSpec((H, H), lambda i: (0, 0)),    # W1  (resident)
                pl.BlockSpec((1, H), lambda i: (0, 0)),    # b1  (resident)
                pl.BlockSpec((1, H), lambda i: (0, 0)),    # w2 row (resident)
                pl.BlockSpec(memory_space=pltpu.MemorySpace.SMEM),  # b2 scalar
            ],
            out_specs=pl.BlockSpec((TB, 1), lambda i: (i, 0)),
        ),
        compiler_params=pltpu.CompilerParams(
            dimension_semantics=("parallel",),   # shard batch tiles across TCs
        ),
    )(h0, wp, bp, w1, b1, w2_row, b2)

    return out[:B]


def first_token_hidden(input_ids, attn_masks, token_type_ids, params):
    """Deterministic stand-in for the pretrained ALBERT encoder (plain-JAX glue).

    Produces only the first-token hidden state [B, H] that feeds the pooler,
    without materializing the full [B, S, H] cont_reps tensor.
    """
    # TODO(synk): real ALBERT transformer stack not implemented in Pallas;
    # replaced by a deterministic synthetic embedding stand-in.
    tok0 = params["tok_emb"][input_ids[:, 0]]               # [B, H]
    pos0 = params["pos_emb"][0][None, :]                    # [1, H]
    typ0 = params["typ_emb"][token_type_ids[:, 0]]          # [B, H]
    mask0 = attn_masks[:, 0:1].astype(jnp.float32)          # [B, 1]
    return (tok0 + pos0 + typ0) * mask0                     # [B, H] f32


def endpoint_classifier_forward(input_ids, attn_masks, token_type_ids, params):
    h0 = first_token_hidden(input_ids, attn_masks, token_type_ids, params)
    return endpoint_classifier_head(
        h0,
        params["wp"], params["bp"],
        params["w1"], params["b1"],
        params["w2"], params["b2"],
    )


def init_params(key, vocab_size, max_seq, hidden):
    ks = jax.random.split(key, 8)
    scale = 0.02
    return {
        "tok_emb": scale * jax.random.normal(ks[0], (vocab_size, hidden), jnp.float32),
        "pos_emb": scale * jax.random.normal(ks[1], (max_seq, hidden), jnp.float32),
        "typ_emb": scale * jax.random.normal(ks[2], (2, hidden), jnp.float32),
        # ALBERT pooler dense, stored [in, out]; bf16 for the MXU.
        "wp": (scale * jax.random.normal(ks[3], (hidden, hidden), jnp.float32)
               ).astype(jnp.bfloat16),
        "bp": jnp.zeros((1, hidden), jnp.float32),
        # cls_layer[0]: Linear(hidden, hidden), stored [in, out]; bf16.
        "w1": (scale * jax.random.normal(ks[4], (hidden, hidden), jnp.float32)
               ).astype(jnp.bfloat16),
        "b1": scale * jax.random.normal(ks[5], (1, hidden), jnp.float32),
        # cls_layer[2]: Linear(hidden, 1), stored as the [1, hidden] row
        # (same layout as PyTorch's weight) for the in-kernel VPU reduce.
        "w2": scale * jax.random.normal(ks[6], (1, hidden), jnp.float32),
        "b2": scale * jax.random.normal(ks[7], (1, 1), jnp.float32),
    }


if __name__ == "__main__":
    key = jax.random.PRNGKey(0)
    B, S, H, V = 2, 8, 32, 100

    pkey, ikey, tkey = jax.random.split(key, 3)
    params = init_params(pkey, vocab_size=V, max_seq=S, hidden=H)

    input_ids = jax.random.randint(ikey, (B, S), 0, V, dtype=jnp.int32)
    attn_masks = jnp.ones((B, S), dtype=jnp.int32)
    token_type_ids = jax.random.randint(tkey, (B, S), 0, 2, dtype=jnp.int32)

    logits = endpoint_classifier_forward(input_ids, attn_masks, token_type_ids, params)
    logits = jax.block_until_ready(logits)

    # Reference in plain JAX with the same bf16-input / f32-accumulate math.
    h0 = first_token_hidden(input_ids, attn_masks, token_type_ids, params)
    h0_bf = h0.astype(jnp.bfloat16)
    pooled_ref = jnp.tanh(
        jnp.dot(h0_bf, params["wp"], preferred_element_type=jnp.float32)
        + params["bp"]
    )
    hidden_ref = jnp.tanh(
        jnp.dot(pooled_ref.astype(jnp.bfloat16), params["w1"],
                preferred_element_type=jnp.float32)
        + params["b1"]
    )
    ref = jnp.sum(hidden_ref * params["w2"], axis=-1, keepdims=True) + params["b2"][0, 0]

    assert logits.shape == (B, 1)
    assert jnp.allclose(logits, ref, atol=1e-4, rtol=1e-4), (logits, ref)

    print("KERNEL_OK")
</pallas_src>

<mosaic_0001>
module attributes {stable_mosaic.version = 11 : i64} {
  func.func @_head_kernel(%arg0: i32, %arg1: memref<8x32xbf16, #tpu.memory_space<vmem>>, %arg2: memref<32x32xbf16, #tpu.memory_space<vmem>>, %arg3: memref<1x32xf32, #tpu.memory_space<vmem>>, %arg4: memref<32x32xbf16, #tpu.memory_space<vmem>>, %arg5: memref<1x32xf32, #tpu.memory_space<vmem>>, %arg6: memref<1x32xf32, #tpu.memory_space<vmem>>, %arg7: memref<1x1xf32, #tpu.memory_space<smem>>, %arg8: memref<8x1xf32, #tpu.memory_space<vmem>>) attributes {dimension_semantics = [#tpu.dimension_semantics<parallel>], iteration_bounds = array<i64: 1>, scalar_prefetch = 0 : i64, scratch_operands = 0 : i64, tpu.core_type = #tpu.core_type<tc>, window_params = [{transform_indices = @transform_0, window_bounds = array<i64: 8, 32>}, {pipeline_mode = #tpu.pipeline_mode<synchronous>, transform_indices = @transform_1, window_bounds = array<i64: 32, 32>}, {pipeline_mode = #tpu.pipeline_mode<synchronous>, transform_indices = @transform_2, window_bounds = array<i64: 1, 32>}, {pipeline_mode = #tpu.pipeline_mode<synchronous>, transform_indices = @transform_3, window_bounds = array<i64: 32, 32>}, {pipeline_mode = #tpu.pipeline_mode<synchronous>, transform_indices = @transform_4, window_bounds = array<i64: 1, 32>}, {pipeline_mode = #tpu.pipeline_mode<synchronous>, transform_indices = @transform_5, window_bounds = array<i64: 1, 32>}, {transform_indices = @transform_6, window_bounds = array<i64: 1, 1>}, {transform_indices = @transform_7, window_bounds = array<i64: 8, 1>}]} {
    %c0 = arith.constant 0 : index
    %c0_0 = arith.constant 0 : index
    %0 = vector.load %arg1[%c0, %c0_0] : memref<8x32xbf16, #tpu.memory_space<vmem>>, vector<8x32xbf16>
    %c0_1 = arith.constant 0 : index
    %c0_2 = arith.constant 0 : index
    %1 = vector.load %arg2[%c0_1, %c0_2] : memref<32x32xbf16, #tpu.memory_space<vmem>>, vector<32x32xbf16>
    %cst = arith.constant dense<0.000000e+00> : vector<8x32xf32>
    %2 = tpu.matmul %0, %1, %cst {dimension_numbers = #tpu.dot_dimension_numbers<[1], [0], [0], [1], [0, 0, 1, 1], [], []>} : vector<8x32xbf16>, vector<32x32xbf16>, vector<8x32xf32> -> vector<8x32xf32>
    %c0_3 = arith.constant 0 : index
    %c0_4 = arith.constant 0 : index
    %3 = vector.load %arg3[%c0_3, %c0_4] : memref<1x32xf32, #tpu.memory_space<vmem>>, vector<1x32xf32>
    %4 = vector.broadcast %3 : vector<1x32xf32> to vector<8x32xf32>
    %5 = arith.addf %2, %4 : vector<8x32xf32>
    %6 = math.tanh %5 : vector<8x32xf32>
    %7 = arith.truncf %6 : vector<8x32xf32> to vector<8x32xbf16>
    %c0_5 = arith.constant 0 : index
    %c0_6 = arith.constant 0 : index
    %8 = vector.load %arg4[%c0_5, %c0_6] : memref<32x32xbf16, #tpu.memory_space<vmem>>, vector<32x32xbf16>
    %cst_7 = arith.constant dense<0.000000e+00> : vector<8x32xf32>
    %9 = tpu.matmul %7, %8, %cst_7 {dimension_numbers = #tpu.dot_dimension_numbers<[1], [0], [0], [1], [0, 0, 1, 1], [], []>} : vector<8x32xbf16>, vector<32x32xbf16>, vector<8x32xf32> -> vector<8x32xf32>
    %c0_8 = arith.constant 0 : index
    %c0_9 = arith.constant 0 : index
    %10 = vector.load %arg5[%c0_8, %c0_9] : memref<1x32xf32, #tpu.memory_space<vmem>>, vector<1x32xf32>
    %11 = vector.broadcast %10 : vector<1x32xf32> to vector<8x32xf32>
    %12 = arith.addf %9, %11 : vector<8x32xf32>
    %13 = math.tanh %12 : vector<8x32xf32>
    %c0_10 = arith.constant 0 : index
    %c0_11 = arith.constant 0 : index
    %14 = vector.load %arg6[%c0_10, %c0_11] : memref<1x32xf32, #tpu.memory_space<vmem>>, vector<1x32xf32>
    %15 = vector.broadcast %14 : vector<1x32xf32> to vector<8x32xf32>
    %16 = arith.mulf %13, %15 : vector<8x32xf32>
    %cst_12 = arith.constant dense<0.000000e+00> : vector<8xf32>
    %17 = vector.multi_reduction <add>, %16, %cst_12 [1] : vector<8x32xf32> to vector<8xf32>
    %18 = vector.shape_cast %17 : vector<8xf32> to vector<8x1xf32>
    %c0_13 = arith.constant 0 : index
    %c0_14 = arith.constant 0 : index
    %19 = memref.load %arg7[%c0_13, %c0_14] : memref<1x1xf32, #tpu.memory_space<smem>>
    %20 = vector.broadcast %19 : f32 to vector<8x1xf32>
    %21 = arith.addf %18, %20 : vector<8x1xf32>
    %c0_15 = arith.constant 0 : index
    %c0_16 = arith.constant 0 : index
    %22 = vector.load %arg8[%c0_15, %c0_16] : memref<8x1xf32, #tpu.memory_space<vmem>>, vector<8x1xf32>
    tpu.vector_store %arg8[%c0_15, %c0_16], %21 {strides = array<i32>} : memref<8x1xf32, #tpu.memory_space<vmem>>, vector<8x1xf32>,
    return
  }
  func.func @transform_0(%arg0: i32) -> (i32, i32) {
    %c0_i32 = arith.constant 0 : i32
    %c0_i32_0 = arith.constant 0 : i32
    return %arg0, %c0_i32 : i32, i32
  }
  func.func @transform_1(%arg0: i32) -> (i32, i32) {
    %c0_i32 = arith.constant 0 : i32
    %c0_i32_0 = arith.constant 0 : i32
    %c0_i32_1 = arith.constant 0 : i32
    return %c0_i32, %c0_i32_0 : i32, i32
  }
  func.func @transform_2(%arg0: i32) -> (i32, i32) {
    %c0_i32 = arith.constant 0 : i32
    %c0_i32_0 = arith.constant 0 : i32
    %c0_i32_1 = arith.constant 0 : i32
    return %c0_i32, %c0_i32_0 : i32, i32
  }
  func.func @transform_3(%arg0: i32) -> (i32, i32) {
    %c0_i32 = arith.constant 0 : i32
    %c0_i32_0 = arith.constant 0 : i32
    %c0_i32_1 = arith.constant 0 : i32
    return %c0_i32, %c0_i32_0 : i32, i32
  }
  func.func @transform_4(%arg0: i32) -> (i32, i32) {
    %c0_i32 = arith.constant 0 : i32
    %c0_i32_0 = arith.constant 0 : i32
    %c0_i32_1 = arith.constant 0 : i32
    return %c0_i32, %c0_i32_0 : i32, i32
  }
  func.func @transform_5(%arg0: i32) -> (i32, i32) {
    %c0_i32 = arith.constant 0 : i32
    %c0_i32_0 = arith.constant 0 : i32
    %c0_i32_1 = arith.constant 0 : i32
    return %c0_i32, %c0_i32_0 : i32, i32
  }
  func.func @transform_6(%arg0: i32) -> (i32, i32) {
    %c0_i32 = arith.constant 0 : i32
    %c0_i32_0 = arith.constant 0 : i32
    %c0_i32_1 = arith.constant 0 : i32
    return %c0_i32, %c0_i32_0 : i32, i32
  }
  func.func @transform_7(%arg0: i32) -> (i32, i32) {
    %c0_i32 = arith.constant 0 : i32
    %c0_i32_0 = arith.constant 0 : i32
    return %arg0, %c0_i32 : i32, i32
  }
}

</mosaic_0001>

<bundles_post_ra>
// kernel: tpu_custom_call.1
= control target key start
LH: loop header
LB: loop body
LE: loop exit
PB: predicated region body
PF: predicated region fallthrough
CT: control target
= control target key end

     0   :  { %13 = vsyncpa [#allocation4], 0  ;;  %s449_s0 = inlined_call_operand.hbm [shape: bf16[8,32], index: 0, kind: input, shape index: {}]   ;;  %s450_s1 = inlined_call_operand.hbm [shape: bf16[32,32], index: 1, kind: input, shape index: {}]   ;;  %s451_s2 = inlined_call_operand.vmem [shape: f32[1,32], index: 2, kind: input, shape index: {}]   ;;  %s452_s3 = inlined_call_operand.hbm [shape: bf16[32,32], index: 3, kind: input, shape index: {}]   ;;  %s453_s4 = inlined_call_operand.vmem [shape: f32[1,32], index: 4, kind: input, shape index: {}]   ;;  %s454_s5 = inlined_call_operand.vmem [shape: f32[1,32], index: 5, kind: input, shape index: {}]   ;;  %s455_s6 = inlined_call_operand.<no memory space> [shape: f32[1,1], index: 6, kind: input, shape index: {}]   ;;  %s456_s7 = inlined_call_operand.vmem [shape: f32[8,1], index: 7, kind: output, shape index: {}]  }
   0x1   :  { %14 = vsyncpa [#allocation6], 0  ;;  %s342_s24 = smov [#allocation5]   ;;  %s272_s28 = scalar_lea.hbm %s450_s1, 256 }
   0x2   :  { %s30_s25 = sshll.u32 %s342_s24, 4  ;;  %p273_p0 = scmp.ne.s32.totalorder %s450_s1, %s272_s28  ;;  %s31_s25 = int_to_ptr.vmem [resolvable:$true] %s30_s25 }
   0x3   :  { %p276_p1 = scmp.lt.u32.totalorder %s272_s28, %s450_s1 }
   0x5   :  { %p278_p2 = pnand %p276_p1, %p273_p0 }
   0x7   :  { %281 = shalt.err (!%p278_p2)
}
   0x8   :  { %s282_s10 = scalar_lea.vmem %s31_s25, 256  ;;  %p287_p4 = scmp.lt.s32.totalorder %s31_s25, %s31_s25 }
   0x9   :  { %p283_p3 = scmp.ne.s32.totalorder %s31_s25, %s282_s10  ;;  %p288_p5 = scmp.lt.s32.totalorder %s282_s10, %s282_s10 }
   0xb   :  { %p289_p6 = por %p288_p5, %p287_p4 }
   0xd   :  { %p290_p7 = pnand %p289_p6, %p283_p3 }
   0xf   :  { %293 = shalt.err (!%p290_p7)
}
  0x10   :  { %s343_s11 = smov 64   ;;  %s344_s12 = smov 4  }
  0x11   :  { %36 = dma.hbm_to_vmem [thread:$0]  %s450_s1, 256, %s31_s25, [#allocation6], %s343_s11, %s343_s11, %s344_s12  }
  0x12   :  { %s345_s15 = smov [#allocation3]   ;;  %s346_s17 = smov [#allocation7]  }
  0x13   :  { %s21_s16 = sshll.u32 %s345_s15, 4  ;;  %s44_s18 = sshll.u32 %s346_s17, 4  ;;  %s22_s16 = int_to_ptr.vmem [resolvable:$true] %s21_s16  ;;  %s45_s18 = int_to_ptr.vmem [resolvable:$true] %s44_s18 }
  0x14   :  { %s294_s21 = scalar_lea.hbm %s449_s0, 64 }
  0x15   :  { %p295_p8 = scmp.ne.s32.totalorder %s449_s0, %s294_s21  ;;  %p298_p9 = scmp.lt.u32.totalorder %s294_s21, %s449_s0 }
  0x17   :  { %p300_p10 = pnand %p298_p9, %p295_p8 }
  0x19   :  { %303 = shalt.err (!%p300_p10)
}
  0x1a   :  { %s304_s1 = scalar_lea.vmem %s22_s16, 64  ;;  %p309_p12 = scmp.lt.s32.totalorder %s22_s16, %s22_s16 }
  0x1b   :  { %p305_p11 = scmp.ne.s32.totalorder %s22_s16, %s304_s1  ;;  %p310_p13 = scmp.lt.s32.totalorder %s304_s1, %s304_s1 }
  0x1d   :  { %p311_p0 = por %p310_p13, %p309_p12 }
  0x1f   :  { %p312_p1 = pnand %p311_p0, %p305_p11 }
  0x21   :  { %315 = shalt.err (!%p312_p1)
}
  0x22   :  { %24 = dma.hbm_to_vmem [thread:$0]  %s449_s0, 64, %s22_s16, [#allocation4]  }
  0x23   :  { %s316_s30 = scalar_lea.hbm %s452_s3, 256 }
  0x24   :  { %p317_p2 = scmp.ne.s32.totalorder %s452_s3, %s316_s30  ;;  %p320_p3 = scmp.lt.u32.totalorder %s316_s30, %s452_s3 }
  0x26   :  { %p322_p4 = pnand %p320_p3, %p317_p2 }
  0x28   :  { %325 = shalt.err (!%p322_p4)
}
  0x29   :  { %s326_s14 = scalar_lea.vmem %s45_s18, 256  ;;  %p331_p6 = scmp.lt.s32.totalorder %s45_s18, %s45_s18 }
  0x2a   :  { %p327_p5 = scmp.ne.s32.totalorder %s45_s18, %s326_s14  ;;  %p332_p7 = scmp.lt.s32.totalorder %s326_s14, %s326_s14 }
  0x2c   :  { %p333_p8 = por %p332_p7, %p331_p6 }
  0x2e   :  { %p334_p9 = pnand %p333_p8, %p327_p5 }
  0x30   :  { %337 = shalt.err (!%p334_p9)
}
  0x31   :  { %50 = dma.hbm_to_vmem [thread:$0]  %s452_s3, 256, %s45_s18, [#allocation6], %s343_s11, %s343_s11, %s344_s12  }
  0x32   :  { %338 = dma.done.wait [#allocation4], 64  }
  0x33   :  { %339 = vsyncadd [#allocation4], 4294967232 }
  0x34   :  { %340 = dma.done.wait [#allocation6], 512  }
  0x35   :  { %341 = vsyncadd [#allocation6], 4294966784  ;;  %v347_v0 = vmov 0.0   ;;  %vm348_vm0 = vmmov 0   ;;  %v264_v1 = vld [vmem:[#allocation5] sm:$0xff]   ;;  %v265_v2 = vld [vmem:[#allocation5 + $0x8] sm:$0xff]   ;;  %v216_v24 = vstv %s455_s6 }
  0x36   :  { %241 = vmatprep.subr.bf16.mxu0 %v347_v0  ;;  %245 = vmatprep.mubr.msk.bf16.mxu0 %vm348_vm0, %v347_v0  ;;  %v67_v3 = vld [vmem:[#allocation3] sm:$0xf]  ;;  %vm91_vm1 = vcmask 261120   ;;  %v266_v4 = vld [vmem:[#allocation7] sm:$0xff]   ;;  %vm218_vm2 = vcmask 7168  }
  0x37   :  { %249 = vmatprep.subr.bf16.mxu1 %v347_v0  ;;  %253 = vmatprep.mubr.msk.bf16.mxu1 %vm348_vm0, %v347_v0  ;;  %v267_v5 = vld [vmem:[#allocation7 + $0x8] sm:$0xff]  }
  0x38   :  { %242 = vmatpush3.bf16.msra.mxu0 %v264_v1  ;;  %250 = vmatpush3.bf16.msra.mxu1 %v266_v4  ;;  %v226_v6 = vld [vmem:[%s451_s2] ss:$0 sm:$0xff] }
  0x39   :  { %243 = vmatprep.subr.bf16.mxu0 %v347_v0  ;;  %251 = vmatprep.subr.bf16.mxu1 %v347_v0  ;;  %v230_v14 = vld [vmem:[%s453_s4] ss:$0 sm:$0xff] }
  0x3a   :  { %v234_v20 = vld [vmem:[%s454_s5] ss:$0 sm:$0xff] }
  0x3c   :  { %244 = vmatpush3.bf16.msra.mxu0 %v265_v2  ;;  %252 = vmatpush3.bf16.msra.mxu1 %v267_v5 }
  0x3f   :  { %246 = vmatmul.mubr.msk.bf16.vlgmr.msra.gmra.mrb[0].mxu0 %vm91_vm1, %v67_v3 }
 0x112   :  { %v129_v7 = vpop.f32.mrb[0].mxu0 }
 0x113   :  { %v130_v8 = vadd.f32 %v226_v6, %v129_v7  ;;  %v247_v9 = vpop.f32.mrb[1].mxu0 }
 0x114   :  { %v132_v10 = vpop.f32.mrb[2].mxu0 }
 0x115   :  { %268 = vtanh.f32 %v130_v8  ;;  %v248_v11 = vpop.f32.mrb[3].mxu0 }
 0x11f   :  { %v269_v12 = vpop.eup %268 }
 0x120   :  { %v136_v13 = vpack.c.bf16 %v269_v12, %v269_v12 }
 0x122   :  { %254 = vmatmul.mubr.msk.bf16.vlgmr.msra.gmra.mrb[0].mxu1 %vm91_vm1, %v136_v13 }
 0x1f5   :  { %v197_v15 = vpop.f32.mrb[0].mxu1 }
 0x1f6   :  { %v198_v16 = vadd.f32 %v230_v14, %v197_v15  ;;  %v255_v17 = vpop.f32.mrb[1].mxu1 }
 0x1f7   :  { %v200_v18 = vpop.f32.mrb[2].mxu1 }
 0x1f8   :  { %270 = vtanh.f32 %v198_v16  ;;  %v256_v19 = vpop.f32.mrb[3].mxu1 }
 0x202   :  { %v271_v21 = vpop.eup %270 }
 0x203   :  { %v211_v22 = vmul.f32 %v271_v21, %v234_v20 }
 0x205   :  { %v212_v23 = vsel %vm91_vm1, %v211_v22, 0.0 }
 0x206   :  { %213 = vadd.xlane.f32.xlu0 %v212_v23 }
 0x293   :  { %v214_v25 = vpop.xlane.xlu0 %213 }
 0x294   :  { %v217_v26 = vadd.f32 %v216_v24, %v214_v25 }
 0x296   :  { %219 = vst.msk [vmem:[%s456_s7] sm:$0xff] %vm218_vm2, %v217_v26 }
 0x297   :  { %224 = vsyncpa [#allocation4], 1 }
 0x298   :  { %225 = vsyncpa [#allocation6], 1 }

</bundles_post_ra>
